<compile_context>
chip_gen: v6e
topology: v6e:2x2x1
jax: 0.10.0
libtpu: 0.0.40
codegen_flags: <defaults>
</compile_context>

<pallas_src>
import jax
import jax.numpy as jnp
from jax.experimental import pallas as pl
from jax.experimental.pallas import tpu as pltpu


def _cdiv(a, b):
    return -(-a // b)


def _round_up(x, m):
    return _cdiv(x, m) * m


def _fused_matmul_kernel(w_ref, b_ref, x_ref, o_ref):
    # w_ref: (P, L)  folded weight  (constant index_map -> resident across steps)
    # b_ref: (P, 1)  folded bias    (resident)
    # x_ref: (L, TN) lane-dense x slab chunk
    # o_ref: (P, TN) lane-dense output chunk (unmasked full-lane stores)
    acc = jnp.dot(w_ref[...], x_ref[...], preferred_element_type=jnp.float32)
    o_ref[...] = (acc + b_ref[...]).astype(o_ref.dtype)


def _moving_average_matrix(seq_len, kernel_size):
    """A[t, s] such that (A @ x)[t] = mean of x over the replicate-padded window at t
    (matches torch front/end repeat + AvgPool1d(kernel_size, stride=1))."""
    pad = (kernel_size - 1) // 2
    idx = jnp.arange(seq_len)[:, None] + jnp.arange(-pad, pad + 1)[None, :]
    idx = jnp.clip(idx, 0, seq_len - 1)                                   # (L, K)
    return jax.nn.one_hot(idx, seq_len, dtype=jnp.float32).sum(axis=1) / kernel_size


def fold_dlinear_weights(w_seasonal, b_seasonal, w_trend, b_trend, *,
                         seq_len, kernel_size, stream_dtype=jnp.float32):
    """One-time fold of (moving-average, seasonal linear, trend linear, biases)
    into W_eff (P, L) in `stream_dtype` and bias (P, 1) in f32."""
    if kernel_size % 2 != 1:
        raise ValueError("kernel_size must be odd (even kernels change the moving-"
                         "average length and the PyTorch module itself would fail).")
    A = _moving_average_matrix(seq_len, kernel_size)                      # (L, L)
    w_eff = (w_seasonal.astype(jnp.float32)
             + jnp.dot((w_trend - w_seasonal).astype(jnp.float32), A,
                       precision=jax.lax.Precision.HIGHEST))              # (P, L)
    bias = (b_seasonal + b_trend).astype(jnp.float32)[:, None]            # (P, 1)
    # stream_dtype=bf16 halves the dominant HBM read traffic on v6e/v7x; validate
    # accuracy before shipping (W_eff mixes terms of different magnitude).
    return w_eff.astype(stream_dtype), bias


def _default_min_lane_chunks():
    # v7x has 2 TensorCores per chip: keep >= 2 grid steps (when N allows) so both
    # stay busy.  v5e/v6e have 1 TC, so extra steps are pure per-step overhead.
    try:
        kind = jax.devices()[0].device_kind.lower()
        if "v7" in kind or "7x" in kind:
            return 2
    except Exception:
        pass
    return 1


def dlinear_apply(x, w_eff, bias, *, block_n=1024, min_chunks=None, out_dtype=None):
    """x: [B, L, C] -> [B, P, C] using the folded (W_eff, bias)."""
    if block_n % 128 != 0:
        raise ValueError("block_n must be a multiple of 128 (lane width).")
    B, L, C = x.shape
    P, Lw = w_eff.shape
    assert Lw == L and bias.shape == (P, 1)
    out_dtype = x.dtype if out_dtype is None else out_dtype
    if min_chunks is None:
        min_chunks = _default_min_lane_chunks()

    # Lane tiling: pick num_chunks first, then the smallest 128-multiple tile that
    # covers N in that many chunks -> padding waste stays small even for unlucky N.
    N = B * C
    num_chunks = max(_cdiv(N, block_n), 1)
    if min_chunks > 1:
        num_chunks = max(num_chunks, min(min_chunks, _cdiv(N, 128)))
    TN = _round_up(_cdiv(N, num_chunks), 128)
    Npad = num_chunks * TN

    # Lane-dense slab: fold batch into the lane dimension (single transpose/reshape;
    # pad only if the 128-multiple requires it).  No ones-row augmentation anymore.
    stream_dtype = w_eff.dtype
    x_slab = jnp.transpose(x, (1, 0, 2)).reshape(L, N).astype(stream_dtype)
    if Npad != N:
        x_slab = jnp.pad(x_slab, ((0, 0), (0, Npad - N)))

    in_itemsize = jnp.dtype(stream_dtype).itemsize
    out_itemsize = jnp.dtype(out_dtype).itemsize
    # VMEM budget: double-buffered x/out tiles + (conservatively double-buffered)
    # resident weight/bias + headroom; capped under v7x's 64 MiB physical VMEM.
    vmem_bytes = (2 * L * TN * in_itemsize + 2 * P * TN * out_itemsize
                  + 2 * (P * L + P) * in_itemsize + (4 << 20))
    vmem_limit = int(min(64 << 20, max(vmem_bytes, 16 << 20)))

    cost = pl.CostEstimate(
        flops=2 * P * L * Npad,
        transcendentals=0,
        bytes_accessed=in_itemsize * (L * Npad + P * L + P)
                       + out_itemsize * P * Npad,
    )

    out_slab = pl.pallas_call(
        _fused_matmul_kernel,
        out_shape=jax.ShapeDtypeStruct((P, Npad), out_dtype),
        grid_spec=pltpu.PrefetchScalarGridSpec(
            num_scalar_prefetch=0,
            grid=(num_chunks,),
            in_specs=[
                pl.BlockSpec((P, L), lambda j: (0, 0)),    # weight: resident
                pl.BlockSpec((P, 1), lambda j: (0, 0)),    # bias:   resident
                pl.BlockSpec((L, TN), lambda j: (0, j)),   # x slab chunk
            ],
            out_specs=pl.BlockSpec((P, TN), lambda j: (0, j)),
        ),
        compiler_params=pltpu.CompilerParams(
            dimension_semantics=("parallel",),
            vmem_limit_bytes=vmem_limit,
            allow_input_fusion=[False, False, True],   # fuse x transpose/pad producer
        ),
        cost_estimate=cost,
    )(w_eff, bias, x_slab)

    # Consumers that can work on the lane-dense (P, B*C) slab should take out_slab
    # directly; this final reshuffle only exists to match the module's (B, P, C).
    return jnp.transpose(out_slab[:, :N].reshape(P, B, C), (1, 0, 2))


def dlinear_forward(x, w_seasonal, b_seasonal, w_trend, b_trend, *,
                    kernel_size, block_n=1024, stream_dtype=jnp.float32):
    """Convenience wrapper: fold weights (once) + apply."""
    w_eff, bias = fold_dlinear_weights(w_seasonal, b_seasonal, w_trend, b_trend,
                                       seq_len=x.shape[1], kernel_size=kernel_size,
                                       stream_dtype=stream_dtype)
    return dlinear_apply(x, w_eff, bias, block_n=block_n)


def dlinear_reference(x, w_seasonal, b_seasonal, w_trend, b_trend, *, kernel_size):
    """Pure-JAX reference mirroring the PyTorch forward (include_pred=0, individual=False)."""
    B, L, C = x.shape
    pad = (kernel_size - 1) // 2
    front = jnp.repeat(x[:, 0:1, :], pad, axis=1)
    end = jnp.repeat(x[:, -1:, :], pad, axis=1)
    xp = jnp.concatenate([front, x, end], axis=1)                   # (B, L+2p, C)
    out_len = L + 2 * pad - kernel_size + 1
    trend = jnp.stack([xp[:, i:i + out_len, :] for i in range(kernel_size)],
                      axis=0).mean(axis=0)                          # (B, L, C)
    seasonal = x - trend
    hi = jax.lax.Precision.HIGHEST
    s_out = jnp.einsum('blc,pl->bpc', seasonal, w_seasonal, precision=hi) \
        + b_seasonal[None, :, None]
    t_out = jnp.einsum('blc,pl->bpc', trend, w_trend, precision=hi) \
        + b_trend[None, :, None]
    return s_out + t_out                                            # (B, P, C)


if __name__ == "__main__":
    # Small but representative DLinear config: seq_len=96, pred_len=24, enc_in=8
    # channels, kernel_size=25, individual=False, include_pred=0.
    # TODO(synk): the include_pred==1 branch (RevIN + project_dict + self.lin1) relies
    # on symbols external/undefined in the source module and is not implemented.
    # TODO(synk): individual=True (per-channel Linear) is not implemented; it would
    # fold into a per-channel W_eff the same way.
    B, L, P, C, K = 32, 96, 24, 8, 25

    key = jax.random.PRNGKey(0)
    kx, k1, k2, k3, k4 = jax.random.split(key, 5)

    x = jax.random.normal(kx, (B, L, C), dtype=jnp.float32)

    # nn.Linear(seq_len, pred_len) init: U(-1/sqrt(in), 1/sqrt(in)); weight shape (P, L).
    bound = 1.0 / jnp.sqrt(jnp.float32(L))
    w_seasonal = jax.random.uniform(k1, (P, L), jnp.float32, -bound, bound)
    b_seasonal = jax.random.uniform(k2, (P,), jnp.float32, -bound, bound)
    w_trend = jax.random.uniform(k3, (P, L), jnp.float32, -bound, bound)
    b_trend = jax.random.uniform(k4, (P,), jnp.float32, -bound, bound)

    out = dlinear_forward(x, w_seasonal, b_seasonal, w_trend, b_trend, kernel_size=K)
    out = jax.block_until_ready(out)

    ref = dlinear_reference(x, w_seasonal, b_seasonal, w_trend, b_trend, kernel_size=K)
    assert out.shape == (B, P, C)
    assert jnp.allclose(out, ref, atol=1e-4, rtol=1e-4), "mismatch vs reference"

    print("KERNEL_OK")
</pallas_src>

<mosaic_0001>
module attributes {stable_mosaic.version = 11 : i64} {
  func.func @_fused_matmul_kernel(%arg0: i32, %arg1: memref<24x96xf32, #tpu.memory_space<vmem>>, %arg2: memref<24x1xf32, #tpu.memory_space<vmem>>, %arg3: memref<96x256xf32, #tpu.memory_space<vmem>>, %arg4: memref<24x256xf32, #tpu.memory_space<vmem>>) attributes {dimension_semantics = [#tpu.dimension_semantics<parallel>], iteration_bounds = array<i64: 1>, scalar_prefetch = 0 : i64, scratch_operands = 0 : i64, tpu.core_type = #tpu.core_type<tc>, window_params = [{pipeline_mode = #tpu.pipeline_mode<synchronous>, transform_indices = @transform_0, window_bounds = array<i64: 24, 96>}, {pipeline_mode = #tpu.pipeline_mode<synchronous>, transform_indices = @transform_1, window_bounds = array<i64: 24, 1>}, {transform_indices = @transform_2, window_bounds = array<i64: 96, 256>}, {transform_indices = @transform_3, window_bounds = array<i64: 24, 256>}]} {
    %c0 = arith.constant 0 : index
    %c0_0 = arith.constant 0 : index
    %0 = vector.load %arg1[%c0, %c0_0] : memref<24x96xf32, #tpu.memory_space<vmem>>, vector<24x96xf32>
    %c0_1 = arith.constant 0 : index
    %c0_2 = arith.constant 0 : index
    %1 = vector.load %arg3[%c0_1, %c0_2] : memref<96x256xf32, #tpu.memory_space<vmem>>, vector<96x256xf32>
    %cst = arith.constant dense<0.000000e+00> : vector<24x256xf32>
    %2 = tpu.matmul %0, %1, %cst {dimension_numbers = #tpu.dot_dimension_numbers<[1], [0], [0], [1], [0, 0, 1, 1], [], []>} : vector<24x96xf32>, vector<96x256xf32>, vector<24x256xf32> -> vector<24x256xf32>
    %c0_3 = arith.constant 0 : index
    %c0_4 = arith.constant 0 : index
    %3 = vector.load %arg2[%c0_3, %c0_4] : memref<24x1xf32, #tpu.memory_space<vmem>>, vector<24x1xf32>
    %4 = vector.broadcast %3 : vector<24x1xf32> to vector<24x256xf32>
    %5 = arith.addf %2, %4 : vector<24x256xf32>
    %c0_5 = arith.constant 0 : index
    %c0_6 = arith.constant 0 : index
    %6 = vector.load %arg4[%c0_5, %c0_6] : memref<24x256xf32, #tpu.memory_space<vmem>>, vector<24x256xf32>
    tpu.vector_store %arg4[%c0_5, %c0_6], %5 {strides = array<i32>} : memref<24x256xf32, #tpu.memory_space<vmem>>, vector<24x256xf32>,
    return
  }
  func.func @transform_0(%arg0: i32) -> (i32, i32) {
    %c0_i32 = arith.constant 0 : i32
    %c0_i32_0 = arith.constant 0 : i32
    %c0_i32_1 = arith.constant 0 : i32
    return %c0_i32, %c0_i32_0 : i32, i32
  }
  func.func @transform_1(%arg0: i32) -> (i32, i32) {
    %c0_i32 = arith.constant 0 : i32
    %c0_i32_0 = arith.constant 0 : i32
    %c0_i32_1 = arith.constant 0 : i32
    return %c0_i32, %c0_i32_0 : i32, i32
  }
  func.func @transform_2(%arg0: i32) -> (i32, i32) {
    %c0_i32 = arith.constant 0 : i32
    %c0_i32_0 = arith.constant 0 : i32
    return %c0_i32, %arg0 : i32, i32
  }
  func.func @transform_3(%arg0: i32) -> (i32, i32) {
    %c0_i32 = arith.constant 0 : i32
    %c0_i32_0 = arith.constant 0 : i32
    return %c0_i32, %arg0 : i32, i32
  }
}

</mosaic_0001>

<bundles_post_ra>
// kernel: tpu_custom_call.1
= control target key start
LH: loop header
LB: loop body
LE: loop exit
PB: predicated region body
PF: predicated region fallthrough
CT: control target
= control target key end

     0   :  { %8 = vsyncpa [#allocation3], 0  ;;  %s328_s0 = inlined_call_operand.vmem [shape: f32[24,96], index: 0, kind: input, shape index: {}]   ;;  %s329_s1 = inlined_call_operand.vmem [shape: f32[24,1], index: 1, kind: input, shape index: {}]   ;;  %s330_s2 = inlined_call_operand.hbm [shape: f32[96,256], index: 2, kind: input, shape index: {}]   ;;  %s331_s3 = inlined_call_operand.hbm [shape: f32[24,256], index: 3, kind: output, shape index: {}]  }
   0x1   :  { %9 = vsyncpa [#allocation4], 0  ;;  %s269_s12 = smov [#allocation2]  }
   0x2   :  { %s19_s13 = sshll.u32 %s269_s12, 4  ;;  %s20_s13 = int_to_ptr.vmem [resolvable:$true] %s19_s13 }
   0x3   :  { %s233_s14 = scalar_lea.vmem %s20_s13, 3072  ;;  %p238_p1 = scmp.lt.s32.totalorder %s20_s13, %s20_s13 }
   0x4   :  { %p234_p0 = scmp.ne.s32.totalorder %s20_s13, %s233_s14  ;;  %p239_p2 = scmp.lt.s32.totalorder %s233_s14, %s233_s14 }
   0x6   :  { %p240_p3 = por %p239_p2, %p238_p1 }
   0x8   :  { %p241_p4 = pnand %p240_p3, %p234_p0 }
   0xa   :  { %244 = shalt.err (!%p241_p4)
}
   0xb   :  { %s270_s15 = smov 256   ;;  %s271_s16 = smov 16  }
   0xc   :  { %25 = dma.hbm_to_vmem [thread:$0]  %s330_s2, 3072, %s20_s13, [#allocation3], %s270_s15, %s270_s15, %s271_s16  }
   0xd   :  { %265 = dma.done.wait [#allocation3], 3072  }
   0xe   :  { %266 = vsyncadd [#allocation3], 4294964224  ;;  %v272_v0 = vmov 0.0   ;;  %v273_v1 = vmov 0   ;;  %v55_v2 = vld [vmem:[#allocation2 + $0xb8] sm:$0xff]  ;;  %v54_v3 = vld [vmem:[#allocation2 + $0xb0] sm:$0xff] }
   0xf   :  { %148 = vmatprep.mubr.f32.mxu0 %v272_v0  ;;  %154 = vmatprep.mubr.f32.mxu1 %v272_v0  ;;  %v53_v4 = vld [vmem:[#allocation2 + $0xa8] sm:$0xff]  ;;  %v52_v5 = vld [vmem:[#allocation2 + $0xa0] sm:$0xff]  ;;  %v51_v6 = vld [vmem:[#allocation2 + $0x98] sm:$0xff]  ;;  %vm74_vm0 = vcmask 785408  }
  0x10   :  { %223 = vset.pattern.permute.xlu0 %v273_v1  ;;  %224 = vset.pattern.permute.xlu1 %v273_v1  ;;  %v50_v7 = vld [vmem:[#allocation2 + $0x90] sm:$0xff]  ;;  %v49_v8 = vld [vmem:[#allocation2 + $0x88] sm:$0xff]  ;;  %v48_v9 = vld [vmem:[#allocation2 + $0x80] sm:$0xff] }
  0x11   :  { %92 = vmatprep.subr.mxu0 %v55_v2  ;;  %193 = vmatprep.subr.mxu1 %v55_v2  ;;  %v47_v10 = vld [vmem:[#allocation2 + $0x78] sm:$0xff]  ;;  %v46_v11 = vld [vmem:[#allocation2 + $0x70] sm:$0xff]  ;;  %v45_v12 = vld [vmem:[#allocation2 + $0x68] sm:$0xff] }
  0x12   :  { %93 = vmatpush1.msra.mxu0 %v54_v3  ;;  %205 = vmatpush1.msra.mxu1 %v54_v3  ;;  %v44_v13 = vld [vmem:[#allocation2 + $0x60] sm:$0xff]  ;;  %v43_v14 = vld [vmem:[#allocation2 + $0x58] sm:$0xff]  ;;  %v42_v15 = vld [vmem:[#allocation2 + $0x50] sm:$0xff] }
  0x13   :  { %94 = vmatprep.subr.mxu0 %v53_v4  ;;  %194 = vmatprep.subr.mxu1 %v53_v4  ;;  %v41_v16 = vld [vmem:[#allocation2 + $0x48] sm:$0xff]  ;;  %v40_v17 = vld [vmem:[#allocation2 + $0x40] sm:$0xff]  ;;  %v39_v18 = vld [vmem:[#allocation2 + $0x38] sm:$0xff] }
  0x14   :  { %95 = vmatpush1.msra.mxu0 %v52_v5  ;;  %206 = vmatpush1.msra.mxu1 %v52_v5  ;;  %v38_v19 = vld [vmem:[#allocation2 + $0x30] sm:$0xff]  ;;  %v37_v20 = vld [vmem:[#allocation2 + $0x28] sm:$0xff]  ;;  %v36_v21 = vld [vmem:[#allocation2 + $0x20] sm:$0xff] }
  0x15   :  { %96 = vmatprep.subr.mxu0 %v51_v6  ;;  %195 = vmatprep.subr.mxu1 %v51_v6  ;;  %v35_v22 = vld [vmem:[#allocation2 + $0x18] sm:$0xff]  ;;  %v34_v23 = vld [vmem:[#allocation2 + $0x10] sm:$0xff]  ;;  %v33_v24 = vld [vmem:[#allocation2 + $0x8] sm:$0xff] }
  0x16   :  { %97 = vmatpush1.msra.mxu0 %v50_v7  ;;  %207 = vmatpush1.msra.mxu1 %v50_v7  ;;  %v32_v25 = vld [vmem:[#allocation2] sm:$0xff]  ;;  %v30_v27 = vld [vmem:[%s328_s0 + $0x8] sm:$0xff]  ;;  %v58_v29 = vld [vmem:[%s329_s1 + $0x10] sm:$0xff] }
  0x17   :  { %98 = vmatprep.subr.mxu0 %v49_v8  ;;  %196 = vmatprep.subr.mxu1 %v49_v8  ;;  %v29_v26 = vld [vmem:[%s328_s0] sm:$0xff]  ;;  %v31_v30 = vld [vmem:[%s328_s0 + $0x10] sm:$0xff]  ;;  %v57_v31 = vld [vmem:[%s329_s1 + $0x8] sm:$0xff]  ;;  %s274_s0 = smov [#allocation5]  }
  0x18   :  { %99 = vmatpush1.msra.mxu0 %v48_v9  ;;  %208 = vmatpush1.msra.mxu1 %v48_v9  ;;  %v56_v28 = vld [vmem:[%s329_s1] sm:$0xff]  ;;  %s178_s30 = sshll.u32 %s274_s0, 4  ;;  %s179_s30 = int_to_ptr.vmem [resolvable:$true] %s178_s30 }
  0x19   :  { %100 = vmatprep.subr.mxu0 %v47_v10  ;;  %197 = vmatprep.subr.mxu1 %v47_v10  ;;  %s245_s1 = scalar_lea.vmem %s179_s30, 768  ;;  %p250_p6 = scmp.lt.s32.totalorder %s179_s30, %s179_s30 }
  0x1a   :  { %101 = vmatpush1.msra.mxu0 %v46_v11  ;;  %209 = vmatpush1.msra.mxu1 %v46_v11  ;;  %p246_p5 = scmp.ne.s32.totalorder %s179_s30, %s245_s1  ;;  %p251_p7 = scmp.lt.s32.totalorder %s245_s1, %s245_s1 }
  0x1b   :  { %102 = vmatprep.subr.mxu0 %v45_v12  ;;  %198 = vmatprep.subr.mxu1 %v45_v12 }
  0x1c   :  { %103 = vmatpush1.msra.mxu0 %v44_v13  ;;  %210 = vmatpush1.msra.mxu1 %v44_v13  ;;  %p252_p8 = por %p251_p7, %p250_p6 }
  0x1d   :  { %104 = vmatprep.subr.mxu0 %v43_v14  ;;  %199 = vmatprep.subr.mxu1 %v43_v14 }
  0x1e   :  { %105 = vmatpush1.msra.mxu0 %v42_v15  ;;  %211 = vmatpush1.msra.mxu1 %v42_v15  ;;  %p253_p9 = pnand %p252_p8, %p246_p5 }
  0x1f   :  { %106 = vmatprep.subr.mxu0 %v41_v16  ;;  %200 = vmatprep.subr.mxu1 %v41_v16 }
  0x20   :  { %107 = vmatpush1.msra.mxu0 %v40_v17  ;;  %212 = vmatpush1.msra.mxu1 %v40_v17 }
  0x21   :  { %108 = vmatprep.subr.mxu0 %v39_v18  ;;  %201 = vmatprep.subr.mxu1 %v39_v18 }
  0x22   :  { %109 = vmatpush1.msra.mxu0 %v38_v19  ;;  %213 = vmatpush1.msra.mxu1 %v38_v19 }
  0x23   :  { %110 = vmatprep.subr.mxu0 %v37_v20  ;;  %202 = vmatprep.subr.mxu1 %v37_v20 }
  0x24   :  { %111 = vmatpush1.msra.mxu0 %v36_v21  ;;  %214 = vmatpush1.msra.mxu1 %v36_v21 }
  0x25   :  { %112 = vmatprep.subr.mxu0 %v35_v22  ;;  %203 = vmatprep.subr.mxu1 %v35_v22 }
  0x26   :  { %113 = vmatpush1.msra.mxu0 %v34_v23  ;;  %215 = vmatpush1.msra.mxu1 %v34_v23 }
  0x27   :  { %114 = vmatprep.subr.mxu0 %v33_v24  ;;  %204 = vmatprep.subr.mxu1 %v33_v24 }
  0x28   :  { %115 = vmatpush1.msra.mxu0 %v32_v25  ;;  %216 = vmatpush1.msra.mxu1 %v32_v25 }
  0x29   :  { %190 = vmatmul.mubr.msk.f32.vlgmr.msra.gmra.mxu0 %vm74_vm0, %v29_v26  ;;  %191 = vmatmul.mubr.msk.f32.vlgmr.msra.gmra.mxu1 %vm74_vm0, %v30_v27 }
  0x2a   :  { %160 = vmatprep.mubr.f32.mxu1 %v272_v0  ;;  %61 = vperm.xlu0 %223, %v56_v28  }
  0x2b   :  { %71 = vperm.xlu1 %224, %v58_v29  }
  0x2d   :  { %192 = vmatmul.mubr.msk.f32.gmra.mxu1 %vm74_vm0, %v31_v30 }
  0x2e   :  { %66 = vperm.xlu0 %223, %v57_v31  }
  0xa5   :  { %v62_v32 = vpop.permute.xlu0 %61 }
  0xa6   :  { %v72_v38 = vpop.permute.xlu1 %71 }
  0xa9   :  { %v67_v33 = vpop.permute.xlu0 %66 }
  0xe9   :  { %v150_v34 = vpop.f32.mrf.mxu0  ;;  %v156_v35 = vpop.f32.mrf.mxu1 }
  0xea   :  { %v151_v36 = vadd.f32 %v150_v34, %v62_v32  ;;  %v157_v37 = vadd.f32 %v156_v35, %v67_v33 }
  0xeb   :  { %v152_v39 = vpop.f32.mrf.mxu0  ;;  %v158_v40 = vpop.f32.mrf.mxu1 }
  0xec   :  { %167 = vst [vmem:[#allocation5] sm:$0xff] %v151_v36  ;;  %169 = vst [vmem:[#allocation5 + $0x10] sm:$0xff] %v157_v37  ;;  %v153_v41 = vadd.f32 %v152_v39, %v62_v32  ;;  %v159_v42 = vadd.f32 %v158_v40, %v67_v33 }
  0xed   :  { %v162_v43 = vpop.f32.mrf.mxu1 }
  0xee   :  { %168 = vst [vmem:[#allocation5 + $0x8] sm:$0xff] %v153_v41  ;;  %170 = vst [vmem:[#allocation5 + $0x18] sm:$0xff] %v159_v42  ;;  %v163_v44 = vadd.f32 %v162_v43, %v72_v38 }
  0xef   :  { %v164_v45 = vpop.f32.mrf.mxu1 }
  0xf0   :  { %171 = vst [vmem:[#allocation5 + $0x20] sm:$0xff] %v163_v44  ;;  %v165_v46 = vadd.f32 %v164_v45, %v72_v38 }
  0xf2   :  { %172 = vst [vmem:[#allocation5 + $0x28] sm:$0xff] %v165_v46 }
  0xf3   :  { %256 = shalt.err (!%p253_p9)
}
  0xf4   :  { %184 = dma.vmem_to_hbm [thread:$0]  %s179_s30, 768, %s331_s3, [#allocation4], %s270_s15, %s270_s15, %s271_s16  }
  0xf5   :  { %267 = dma.done.wait [#allocation4], 768  }
  0xf6   :  { %268 = vsyncadd [#allocation4], 4294966528 }
  0xf7   :  { %188 = vsyncpa [#allocation3], 1 }
  0xf8   :  { %189 = vsyncpa [#allocation4], 1 }

</bundles_post_ra>
